<compile_context>
chip_gen: v7x
topology: tpu7x:2x2x1
jax: 0.10.0
libtpu: 0.0.40
codegen_flags: <defaults>
</compile_context>

<pallas_src>
import functools
import math

import jax
import jax.numpy as jnp
import numpy as np
from jax import lax
from jax.experimental import pallas as pl
from jax.experimental.pallas import tpu as pltpu


# ---------------------------------------------------------------------------
# init-time helpers (mirror Filtering.__init__), all host-side numpy
# ---------------------------------------------------------------------------
def _ramp_filter_np(ct_spec, scale):
    """Discrete equiangular fan-beam ramp filter, length 2*num_det/scale - 1."""
    n_det = int(ct_spec['num_det']) // scale
    n = np.arange(-(n_det - 1), n_det, dtype=np.float64)
    dbeta = float(ct_spec['det_interval']) * scale / float(ct_spec['SDD'])
    h = np.zeros_like(n)
    h[n_det - 1] = 1.0 / (8.0 * dbeta * dbeta)
    odd = (np.abs(n).astype(np.int64) % 2) == 1
    h[odd] = -0.5 / (np.pi * np.sin(n[odd] * dbeta)) ** 2
    return h


def make_filtering_state(ct_spec, max_scale):
    """Precompute, per scale s = 0..log2(max_scale):
         * the scaled ramp filter (as in the module's __init__), and
         * the cos-folded, lane-padded Toeplitz matrix split into bf16 hi/lo.
    """
    delta_b = float(ct_spec['det_interval']) / float(ct_spec['SDD'])
    filters, mats = [], []
    for s in range(int(math.log2(max_scale)) + 1):
        sc = 2 ** s
        h = _ramp_filter_np(ct_spec, sc) * float(sc) * delta_b      # length L
        filters.append(jnp.asarray(h, jnp.float32))

        d_in = int(ct_spec['num_det']) // sc
        L = int(h.shape[0])
        pad = int((ct_spec['num_det'] / sc * 2 - 1) // 2)
        d_out = d_in + 2 * pad - L + 1

        # per-detector cosine weights, folded into the matrix rows
        s_range = (float(ct_spec['det_interval']) / float(ct_spec['SDD'])) * (
            np.linspace((1 - d_in) / 2.0, (d_in - 1) / 2.0, d_in) * sc)
        cos_w = float(ct_spec['SCD']) / 10000.0 * np.cos(s_range)

        # cross-correlation as a Toeplitz matmul: out[v,d] = sum_i x[v,i]*h[i-d+pad]
        ii = np.arange(d_in)[:, None]
        dd = np.arange(d_out)[None, :]
        kk = ii - dd + pad
        M = np.where((kk >= 0) & (kk < L), h[np.clip(kk, 0, L - 1)], 0.0)
        M = M * cos_w[:, None]

        # lane-dense output: zero-pad columns up to a multiple of 128
        d_out_p = ((d_out + 127) // 128) * 128
        Mp = np.zeros((d_in, d_out_p), np.float32)
        Mp[:, :d_out] = M.astype(np.float32)

        # bf16_3x split of the (tiny, one-time) weight matrix
        m_f32 = jnp.asarray(Mp, jnp.float32)
        m_hi = m_f32.astype(jnp.bfloat16)
        m_lo = (m_f32 - m_hi.astype(jnp.float32)).astype(jnp.bfloat16)
        mats.append(dict(m_hi=m_hi, m_lo=m_lo,
                         d_in=d_in, d_out=d_out, d_out_p=d_out_p))
    return {'filters': filters, 'mats': mats, 'ct_spec': ct_spec}


# ---------------------------------------------------------------------------
# Pallas kernel: pure streaming matmul, bf16_3x (== Precision.HIGH) on the MXU
# ---------------------------------------------------------------------------
def _filter_kernel(x_ref, mhi_ref, mlo_ref, o_ref):
    # x_ref  : VMEM (TM, Din)      f32 rows = flattened (batch, ch, view)
    # mhi_ref: VMEM (Din, DoutP)   bf16 hi part of cos-folded Toeplitz (resident)
    # mlo_ref: VMEM (Din, DoutP)   bf16 lo part (resident)
    # o_ref  : VMEM (TM, DoutP)    f32
    x = x_ref[...]
    x_hi = x.astype(jnp.bfloat16)
    x_lo = (x - x_hi.astype(jnp.float32)).astype(jnp.bfloat16)
    acc = jnp.dot(x_hi, mhi_ref[...], preferred_element_type=jnp.float32)
    acc = acc + jnp.dot(x_lo, mhi_ref[...], preferred_element_type=jnp.float32)
    acc = acc + jnp.dot(x_hi, mlo_ref[...], preferred_element_type=jnp.float32)
    o_ref[...] = acc


def _pick_tile_rows(rows, d_in, d_out_p, block_rows, vmem_budget_bytes,
                    min_steps=4):
    """Largest row tile fitting the VMEM budget, keeping >= min_steps grid steps."""
    mat_bytes = 2 * 2 * d_in * d_out_p * 2          # hi+lo, double-buffered, bf16
    per_row = 2 * 4 * (d_in + d_out_p)              # in+out tiles, dbl-buffered, f32
    cap = max(8, (vmem_budget_bytes - mat_bytes) // per_row)
    tm = min(block_rows, cap)
    tm = min(tm, max(8, -(-rows // min_steps)))     # >= min_steps steps when possible
    tm = max(8, (tm // 8) * 8)
    return int(tm)


# ---------------------------------------------------------------------------
# Forward wrapper (Filtering.forward)
# ---------------------------------------------------------------------------
def filtering_forward(sinogram, scale, state, *, block_rows=1024,
                      vmem_budget_bytes=24 * 1024 * 1024):
    B, C, V, d_in = sinogram.shape
    mat = state['mats'][int(math.log2(scale))]
    assert d_in == mat['d_in'], (
        f"detector count {d_in} != num_det/scale = {mat['d_in']}")
    d_out, d_out_p = mat['d_out'], mat['d_out_p']

    # flatten (batch, ch, view) into one dense row axis and tile it
    rows = B * C * V
    tm = _pick_tile_rows(rows, d_in, d_out_p, block_rows, vmem_budget_bytes)
    rows_p = pl.cdiv(rows, tm) * tm

    x2 = sinogram.reshape(rows, d_in).astype(jnp.float32)
    if rows_p != rows:
        x2 = jnp.pad(x2, ((0, rows_p - rows), (0, 0)))

    out2 = pl.pallas_call(
        _filter_kernel,
        out_shape=jax.ShapeDtypeStruct((rows_p, d_out_p), jnp.float32),
        grid=(rows_p // tm,),
        in_specs=[
            pl.BlockSpec((tm, d_in), lambda g: (g, 0)),        # sinogram rows
            pl.BlockSpec((d_in, d_out_p), lambda g: (0, 0)),   # filter matrix (hi)
            pl.BlockSpec((d_in, d_out_p), lambda g: (0, 0)),   # filter matrix (lo)
        ],
        out_specs=pl.BlockSpec((tm, d_out_p), lambda g: (g, 0)),
        compiler_params=pltpu.CompilerParams(
            dimension_semantics=("parallel",),
            vmem_limit_bytes=32 * 1024 * 1024,
        ),
    )(x2, mat['m_hi'], mat['m_lo'])

    return out2[:rows, :d_out].reshape(B, C, V, d_out)


# ---------------------------------------------------------------------------
# Pure-JAX reference (cosine weighting + explicit padded conv, f32 HIGHEST)
# ---------------------------------------------------------------------------
def _reference(sinogram, scale, ct_spec, filters):
    B, C, V, d_in = sinogram.shape
    s_range = (ct_spec['det_interval'] / ct_spec['SDD']) * (
        jnp.linspace((1 - d_in) / 2.0, (d_in - 1) / 2.0, d_in) * scale)
    cos_w = ct_spec['SCD'] / 10000.0 * jnp.cos(s_range)
    xw = sinogram.astype(jnp.float32) * cos_w[None, None, None, :]
    filt = filters[int(math.log2(scale))]
    L = int(filt.shape[0])
    pad = int((ct_spec['num_det'] / scale * 2 - 1) // 2)
    w = filt.reshape(1, 1, 1, L).astype(jnp.float32)
    return lax.conv_general_dilated(
        xw, w, window_strides=(1, 1), padding=((0, 0), (pad, pad)),
        dimension_numbers=('NCHW', 'OIHW', 'NCHW'),
        precision=lax.Precision.HIGHEST)


if __name__ == "__main__":
    # small shapes consistent with the module (det = num_det // scale, ch = 1)
    ct_spec = {'det_interval': 1.0, 'SDD': 1000.0, 'SCD': 500.0, 'num_det': 256}
    max_scale = 2
    scale = 2
    B, C, V = 2, 1, 256
    det = ct_spec['num_det'] // scale          # 128

    state = make_filtering_state(ct_spec, max_scale)

    key = jax.random.PRNGKey(0)
    sinogram = jax.random.normal(key, (B, C, V, det), jnp.float32)

    fwd = jax.jit(functools.partial(filtering_forward, scale=scale, state=state))
    out = fwd(sinogram)
    jax.block_until_ready(out)

    ref = _reference(sinogram, scale, ct_spec, state['filters'])
    # tolerance reflects the intentional bf16_3x (Precision.HIGH-equivalent) matmul
    np.testing.assert_allclose(np.asarray(out), np.asarray(ref),
                               rtol=2e-4, atol=1e-3)

    print("KERNEL_OK")
</pallas_src>

<mosaic_0001>
module attributes {stable_mosaic.version = 11 : i64} {
  func.func @_filter_kernel(%arg0: i32, %arg1: memref<128x128xf32, #tpu.memory_space<vmem>>, %arg2: memref<128x128xbf16, #tpu.memory_space<vmem>>, %arg3: memref<128x128xbf16, #tpu.memory_space<vmem>>, %arg4: memref<128x128xf32, #tpu.memory_space<vmem>>) attributes {dimension_semantics = [#tpu.dimension_semantics<parallel>], iteration_bounds = array<i64: 4>, scalar_prefetch = 0 : i64, scratch_operands = 0 : i64, tpu.core_type = #tpu.core_type<tc>, window_params = [{transform_indices = @transform_0, window_bounds = array<i64: 128, 128>}, {pipeline_mode = #tpu.pipeline_mode<synchronous>, transform_indices = @transform_1, window_bounds = array<i64: 128, 128>}, {pipeline_mode = #tpu.pipeline_mode<synchronous>, transform_indices = @transform_2, window_bounds = array<i64: 128, 128>}, {transform_indices = @transform_3, window_bounds = array<i64: 128, 128>}]} {
    %c0 = arith.constant 0 : index
    %c0_0 = arith.constant 0 : index
    %0 = vector.load %arg1[%c0, %c0_0] : memref<128x128xf32, #tpu.memory_space<vmem>>, vector<128x128xf32>
    %1 = arith.truncf %0 : vector<128x128xf32> to vector<128x128xbf16>
    %2 = arith.extf %1 : vector<128x128xbf16> to vector<128x128xf32>
    %3 = arith.subf %0, %2 : vector<128x128xf32>
    %4 = arith.truncf %3 : vector<128x128xf32> to vector<128x128xbf16>
    %c0_1 = arith.constant 0 : index
    %c0_2 = arith.constant 0 : index
    %5 = vector.load %arg2[%c0_1, %c0_2] : memref<128x128xbf16, #tpu.memory_space<vmem>>, vector<128x128xbf16>
    %cst = arith.constant dense<0.000000e+00> : vector<128x128xf32>
    %6 = tpu.matmul %1, %5, %cst {dimension_numbers = #tpu.dot_dimension_numbers<[1], [0], [0], [1], [0, 0, 1, 1], [], []>} : vector<128x128xbf16>, vector<128x128xbf16>, vector<128x128xf32> -> vector<128x128xf32>
    %c0_3 = arith.constant 0 : index
    %c0_4 = arith.constant 0 : index
    %7 = vector.load %arg2[%c0_3, %c0_4] : memref<128x128xbf16, #tpu.memory_space<vmem>>, vector<128x128xbf16>
    %cst_5 = arith.constant dense<0.000000e+00> : vector<128x128xf32>
    %8 = tpu.matmul %4, %7, %cst_5 {dimension_numbers = #tpu.dot_dimension_numbers<[1], [0], [0], [1], [0, 0, 1, 1], [], []>} : vector<128x128xbf16>, vector<128x128xbf16>, vector<128x128xf32> -> vector<128x128xf32>
    %9 = arith.addf %6, %8 : vector<128x128xf32>
    %c0_6 = arith.constant 0 : index
    %c0_7 = arith.constant 0 : index
    %10 = vector.load %arg3[%c0_6, %c0_7] : memref<128x128xbf16, #tpu.memory_space<vmem>>, vector<128x128xbf16>
    %cst_8 = arith.constant dense<0.000000e+00> : vector<128x128xf32>
    %11 = tpu.matmul %1, %10, %cst_8 {dimension_numbers = #tpu.dot_dimension_numbers<[1], [0], [0], [1], [0, 0, 1, 1], [], []>} : vector<128x128xbf16>, vector<128x128xbf16>, vector<128x128xf32> -> vector<128x128xf32>
    %12 = arith.addf %9, %11 : vector<128x128xf32>
    %c0_9 = arith.constant 0 : index
    %c0_10 = arith.constant 0 : index
    %13 = vector.load %arg4[%c0_9, %c0_10] : memref<128x128xf32, #tpu.memory_space<vmem>>, vector<128x128xf32>
    tpu.vector_store %arg4[%c0_9, %c0_10], %12 {strides = array<i32>} : memref<128x128xf32, #tpu.memory_space<vmem>>, vector<128x128xf32>,
    return
  }
  func.func @transform_0(%arg0: i32) -> (i32, i32) {
    %c0_i32 = arith.constant 0 : i32
    %c0_i32_0 = arith.constant 0 : i32
    return %arg0, %c0_i32 : i32, i32
  }
  func.func @transform_1(%arg0: i32) -> (i32, i32) {
    %c0_i32 = arith.constant 0 : i32
    %c0_i32_0 = arith.constant 0 : i32
    %c0_i32_1 = arith.constant 0 : i32
    return %c0_i32, %c0_i32_0 : i32, i32
  }
  func.func @transform_2(%arg0: i32) -> (i32, i32) {
    %c0_i32 = arith.constant 0 : i32
    %c0_i32_0 = arith.constant 0 : i32
    %c0_i32_1 = arith.constant 0 : i32
    return %c0_i32, %c0_i32_0 : i32, i32
  }
  func.func @transform_3(%arg0: i32) -> (i32, i32) {
    %c0_i32 = arith.constant 0 : i32
    %c0_i32_0 = arith.constant 0 : i32
    return %arg0, %c0_i32 : i32, i32
  }
}

</mosaic_0001>

<bundles_post_ra>
// kernel: filtering_forward.1
= control target key start
LH: loop header
LB: loop body
LE: loop exit
PB: predicated region body
PF: predicated region fallthrough
CT: control target
= control target key end

     0   :  { %8 = vsyncpa [#allocation3], 0  ;;  %s1661_s0 = inlined_call_operand.hbm [shape: f32[512,128], index: 0, kind: input, shape index: {}]   ;;  %s1662_s1 = inlined_call_operand.hbm [shape: bf16[128,128], index: 1, kind: input, shape index: {}]   ;;  %s1663_s2 = inlined_call_operand.hbm [shape: bf16[128,128], index: 2, kind: input, shape index: {}]   ;;  %s1664_s3 = inlined_call_operand.hbm [shape: f32[512,128], index: 3, kind: output, shape index: {}]  }
   0x1   :  { %10 = vsyncpa [#allocation3 + $0x1], 0 }
   0x2   :  { %11 = vsyncpa [#allocation6], 0 }
   0x3   :  { %12 = vsyncpa [#allocation4], 0 }
   0x4   :  { %14 = vsyncpa [#allocation4 + $0x1], 0  ;;  %s1347_s12 = smov 0   ;;  %s1349_s13 = smov 0  }
   0x5   :  { %s1351_s14 = smov 0   ;;  %s1353_s15 = smov 0  }
   0x6 LB: > { %s1368_s16 = sadd.s32 4294967295, %s1315_s15   ;;  %s842_s17 = sadd.s32 4294967294, %s1315_s15   ;;  %s1315_s15 = sphi %s1353_s15, %s1683_s15   ;;  %s1311_s14 = sphi %s1351_s14, %s1682_s14   ;;  %s1307_s13 = sphi %s1349_s13, %s1681_s13   ;;  %s1303_s12 = sphi %s1347_s12, %s1680_s12  }
   0x7   : > { %p40_p0 = scmp.ne.s32.totalorder %s1307_s13, %s1303_s12  ;;  %p1665_p1 = scmp.eq.s32.totalorder %s1368_s16, 0 }
   0x8   : > { %p112_p3 = scmp.eq.s32.totalorder %s842_s17, 3  ;;  %p843_p5 = scmp.ge.s32.totalorder %s1315_s15, 1 }
   0x9   : > { %p1377_p4 = por %p1665_p1, %p40_p0  ;;  %p119_p7 = scmp.lt.s32.totalorder %s1315_s15, 5 }
   0xa   : > { %p1382_p6 = por %p112_p3, %p40_p0  ;;  %s1317_s21 = smov [#allocation5]  }
   0xb   : > { %s1668_s18 = scalar_select %p1377_p4, 1, 0 }
   0xc   : > { %s1669_s19 = scalar_select %p1382_p6, 1, 0 }
   0xd   : > { %p1387_p8 = pnand %p843_p5, %p119_p7  ;;  %s131_s22 = sshll.u32 %s1317_s21, 4  ;;  %s132_s22 = int_to_ptr.vmem [resolvable:$true] %s131_s22 }
   0xe   : > { %s1318_s24 = smov [#allocation7]   ;;  %s1159_s28 = scalar_lea.hbm %s1662_s1, 1024 }
   0xf   : > { %s1670_s20 = scalar_select %p1387_p8, 1, 0 }
  0x10   : > { %p1082_p9 = pneg %p1387_p8  ;;  %s144_s25 = sshll.u32 %s1318_s24, 4  ;;  %s1399_s25 = int_to_ptr.vmem [resolvable:$true] %s144_s25 }
  0x11   : > { %p1160_p11 = scmp.ne.s32.totalorder %s1662_s1, %s1159_s28  ;;  %p1166_p3 = scmp.lt.u32.totalorder %s1159_s28, %s1662_s1 }
  0x12   : > { %p1395_p10 = pnand %p1082_p9, %p1665_p1 }
  0x14   : > { %p1161_p12 = pneg %p1395_p10 }
  0x16   : > { %p1162_p13 = pnand %p1161_p12, %p1160_p11 }
  0x18   : > { %p1163_p0 = pneg %p1162_p13 }
  0x1a   : > { %p1168_p5 = pnand %p1166_p3, %p1163_p0 }
  0x1c   : > { %1171 = shalt.err (!%p1168_p5)
}
  0x1d   : > { %s1172_s6 = scalar_lea.vmem %s132_s22, 1024  ;;  %p1180_p2 = scmp.lt.s32.totalorder %s132_s22, %s132_s22 }
  0x1e   : > { %p1173_p7 = scmp.ne.s32.totalorder %s132_s22, %s1172_s6  ;;  %p1181_p6 = scmp.lt.s32.totalorder %s1172_s6, %s1172_s6 }
  0x20   : > { %p1175_p9 = pnand %p1173_p7, %p1161_p12  ;;  %p1182_p4 = por %p1181_p6, %p1180_p2 }
  0x22   : > { %p1176_p1 = pneg %p1175_p9 }
  0x24   : > { %p1183_p8 = pnand %p1182_p4, %p1176_p1 }
  0x26   : > { %1186 = shalt.err (!%p1183_p8)
}
  0x27   : > { %s1319_s7 = smov 64   ;;  %s1320_s8 = smov 4  }
  0x28   : > { %1085 = dma.hbm_to_vmem [thread:$0]  (!%p1395_p10), %s1662_s1, 1024, %s132_s22, [#allocation6], %s1319_s7, %s1319_s7, %s1320_s8  }
  0x29   : > { %s1187_s21 = scalar_lea.hbm %s1663_s2, 1024 }
  0x2a   : > { %p1188_p11 = scmp.ne.s32.totalorder %s1663_s2, %s1187_s21  ;;  %p1194_p4 = scmp.lt.u32.totalorder %s1187_s21, %s1663_s2 }
  0x2c   : > { %p1190_p1 = pnand %p1188_p11, %p1161_p12 }
  0x2e   : > { %p1191_p2 = pneg %p1190_p1 }
  0x30   : > { %p1196_p6 = pnand %p1194_p4, %p1191_p2 }
  0x32   : > { %1199 = shalt.err (!%p1196_p6)
}
  0x33   : > { %s1200_s22 = scalar_lea.vmem %s1399_s25, 1024  ;;  %p1208_p3 = scmp.lt.s32.totalorder %s1399_s25, %s1399_s25 }
  0x34   : > { %p1201_p8 = scmp.ne.s32.totalorder %s1399_s25, %s1200_s22  ;;  %p1209_p5 = scmp.lt.s32.totalorder %s1200_s22, %s1200_s22 }
  0x36   : > { %p1203_p13 = pnand %p1201_p8, %p1161_p12  ;;  %p1210_p7 = por %p1209_p5, %p1208_p3 }
  0x38   : > { %p1204_p0 = pneg %p1203_p13 }
  0x3a   : > { %p1211_p9 = pnand %p1210_p7, %p1204_p0 }
  0x3c   : > { %1214 = shalt.err (!%p1211_p9)
}
  0x3d   : > { %1088 = dma.hbm_to_vmem [thread:$0]  (!%p1395_p10), %s1663_s2, 1024, %s1399_s25, [#allocation6], %s1319_s7, %s1319_s7, %s1320_s8  }
  0x3e   : > { %s1449_s4 = sadd.s32 1, %s1315_s15   ;;  %s27_s23 = sadd.s32 1, %s1311_s14 }
  0x3f   : > { %s24_s5 = ssub.s32 %s1315_s15, %s1449_s4  ;;  %p34_p12 = scmp.ne.s32.totalorder %s1311_s14, %s1307_s13 }
  0x40   : > { %p25_p11 = scmp.eq.s32.totalorder %s24_s5, 0  ;;  %p35_p1 = scmp.eq.s32.totalorder %s1315_s15, 0 }
  0x41   : > { %p1672_p2 = scmp.eq.s32.totalorder %s1368_s16, 3  ;;  %p1099_p6 = scmp.lt.s32.totalorder %s1315_s15, 4 }
  0x42   : > { %s1465_s9 = scalar_select %p25_p11, %s1311_s14, %s27_s23  }
  0x43   : > { %p1459_p4 = por %p1672_p2, %p34_p12  ;;  %p36_p8 = por %p35_p1, %p34_p12 }
  0x44   : > { %s158_s10 = sand.u32 1, %s1311_s14   ;;  %s876_s25 = sshll.u32 %s1315_s15, 11 }
  0x45   : > { %s847_s11 = sshll.u32 %s158_s10, 7  ;;  %s1472_s17 = scalar_lea.hbm %s1661_s0, %s876_s25 }
  0x46   : > { %s162_s21 = scalar_lea.vmem [#allocation2], %s847_s11  ;;  %p1476_p10 = pnand %p1099_p6, %p36_p8 }
  0x47   : > { %s169_s24 = sshll.u32 %s162_s21, 4  ;;  %s1480_s27 = scalar_lea.sflag [#allocation3], %s158_s10  ;;  %s1474_s24 = int_to_ptr.vmem [resolvable:$true] %s169_s24 }
  0x48   : > { %s1215_s28 = scalar_lea.hbm %s1472_s17, 2048  ;;  %p1217_p0 = pneg %p1476_p10 }
  0x49   : > { %p1216_p13 = scmp.ne.s32.totalorder %s1472_s17, %s1215_s28  ;;  %s1220_s30 = scalar_lea.hbm %s1661_s0, 8192 }
  0x4a   : > { %p1221_p7 = scmp.lt.u32.totalorder %s1472_s17, %s1661_s0  ;;  %p1222_p9 = scmp.lt.u32.totalorder %s1220_s30, %s1215_s28 }
  0x4b   : > { %p1218_p3 = pnand %p1217_p0, %p1216_p13  ;;  %p1224_p11 = scmp.lt.u32.totalorder %s1215_s28, %s1472_s17 }
  0x4c   : > { %p1223_p12 = por %p1222_p9, %p1221_p7 }
  0x4d   : > { %p1219_p5 = pneg %p1218_p3 }
  0x4e   : > { %p1225_p1 = por %p1224_p11, %p1223_p12 }
  0x50   : > { %p1226_p2 = pnand %p1225_p1, %p1219_p5 }
  0x52   : > { %1229 = shalt.err (!%p1226_p2)
}
  0x53   : > { %s1230_s10 = scalar_lea.vmem %s1474_s24, 2048  ;;  %s1321_s11 = smov [#allocation2]  }
  0x54   : > { %p1231_p6 = scmp.ne.s32.totalorder %s1474_s24, %s1230_s10  ;;  %s1235_s25 = sshll.u32 %s1321_s11, 4  ;;  %s1236_s25 = int_to_ptr.vmem [resolvable:$false] %s1235_s25 }
  0x55   : > { %s1237_s7 = scalar_lea.vmem %s1236_s25, 4096  ;;  %p1238_p3 = scmp.lt.s32.totalorder %s1474_s24, %s1236_s25 }
  0x56   : > { %p1233_p8 = pnand %p1231_p6, %p1217_p0  ;;  %p1239_p7 = scmp.lt.s32.totalorder %s1237_s7, %s1230_s10 }
  0x58   : > { %p1234_p13 = pneg %p1233_p8  ;;  %p1240_p9 = por %p1239_p7, %p1238_p3 }
  0x5a   : > { %p1241_p12 = pnand %p1240_p9, %p1234_p13 }
  0x5c   : > { %1244 = shalt.err (!%p1241_p12)
}
  0x5d   : > { %s1322_s8 = smov 128   ;;  %s1323_s21 = smov 8  }
  0x5e   : > { %1092 = dma.hbm_to_vmem [thread:$0]  (!%p1476_p10), %s1472_s17, 2048, %s1474_s24, %s1480_s27, %s1322_s8, %s1322_s8, %s1323_s21  }
  0x5f   : > { %p1675_p0 = scmp.ne.s32.totalorder %s1670_s20, 0 }
  0x60   : > { %s1511_s28 = sand.u32 (!%p1675_p0), 1, %s1307_s13   ;;  %p1676_p5 = scmp.ne.s32.totalorder (!%p1675_p0), %s1668_s18, 0 }
  0x61   : > { %181 = sbr.rel (%p1675_p0) target bundleno = 413 (0x19d), region = 32  ;;  %s851_s22 = sshll.u32 (!%p1675_p0), %s1511_s28, 7 }
  0x62   : > { %s184_s29 = scalar_lea.sflag (!%p1675_p0), [#allocation3], %s1511_s28  ;;  %s1517_s30 = scalar_lea.vmem (!%p1675_p0), [#allocation2], %s851_s22 }
  0x68   : > { %1290 = dma.done.wait (%p1676_p5), %s184_s29, 2048  }
  0x69   : > { %1292 = vsyncadd (%p1676_p5), %s184_s29, 4294965248  ;;  %p1677_p10 = scmp.eq.s32.totalorder %s1368_s16, 0 }
  0x6b   : > { %1294 = dma.done.wait (%p1677_p10), [#allocation6], 2048   ;;  %p1678_p11 = pmov %p1677_p10 }
  0x6c   : > { %v1143_v0 = vld [vmem:[#allocation5] sm:$0xff]   ;;  %v1144_v1 = vld [vmem:[#allocation5 + $0x8] sm:$0xff]   ;;  %v1145_v2 = vld [vmem:[#allocation5 + $0x10] sm:$0xff]   ;;  %s1591_s18 = scalar_lea.vmem [#allocation8], %s851_s22  ;;  %s877_s20 = sshll.u32 %s1368_s16, 11 }
  0x6d   : > { %1296 = vsyncadd (%p1678_p11), [#allocation6], 4294965248  ;;  %926 = vmatprep.subr.bf16.mxu1 %v1143_v0  ;;  %958 = vmatprep.subr.bf16.mxu0 %v1143_v0  ;;  %v1146_v3 = vld [vmem:[#allocation5 + $0x18] sm:$0xff]   ;;  %v221_v4 = vld [vmem:[%s1517_s30] sm:$0xff]  ;;  %s750_s17 = sshll.u32 %s1591_s18, 4  ;;  %s1609_s26 = scalar_lea.hbm %s1664_s3, %s877_s20  ;;  %s1611_s17 = int_to_ptr.vmem [resolvable:$true] %s750_s17 }
  0x6e   : > { %927 = vmatpush3.bf16.msra.mxu1 %v1143_v0  ;;  %959 = vmatpush3.bf16.msra.mxu0 %v1143_v0  ;;  %v222_v5 = vld [vmem:[%s1517_s30 + $0x8] sm:$0xff]  ;;  %v1147_v9 = vld [vmem:[#allocation5 + $0x20] sm:$0xff]   ;;  %v223_v13 = vld [vmem:[%s1517_s30 + $0x10] sm:$0xff]  ;;  %s737_s27 = scalar_lea.sflag [#allocation4], %s1511_s28  ;;  %s1245_s23 = scalar_lea.vmem %s1611_s17, 2048 }
  0x6f   : > { %928 = vmatprep.subr.bf16.mxu1 %v1144_v1  ;;  %960 = vmatprep.subr.bf16.mxu0 %v1144_v1  ;;  %v1529_v6 = vpack.c.bf16 %v222_v5, %v221_v4  ;;  %v224_v14 = vld [vmem:[%s1517_s30 + $0x18] sm:$0xff]  ;;  %v1148_v15 = vld [vmem:[#allocation5 + $0x28] sm:$0xff]   ;;  %v225_v17 = vld [vmem:[%s1517_s30 + $0x20] sm:$0xff]  ;;  %p1246_p1 = scmp.ne.s32.totalorder %s1611_s17, %s1245_s23  ;;  %s1324_s5 = smov [#allocation8]  }
  0x70   : > { %v1536_v16 = vpack.c.bf16 %v224_v14, %v223_v13  ;;  %v226_v18 = vld [vmem:[%s1517_s30 + $0x28] sm:$0xff]  ;;  %v1149_v19 = vld [vmem:[#allocation5 + $0x30] sm:$0xff]   ;;  %v228_v24 = vld [vmem:[%s1517_s30 + $0x38] sm:$0xff]  ;;  %s1249_s10 = sshll.u32 %s1324_s5, 4  ;;  %s1250_s10 = int_to_ptr.vmem [resolvable:$false] %s1249_s10 }
  0x71   : > { %v245_v7 = vunpack.c.l.bf16 %v1529_v6  ;;  %v246_v8 = vunpack.c.h.bf16 %v1529_v6  ;;  %974 = vmatprep.mubr.bf16.mxu0 %v1529_v6  ;;  %v1540_v20 = vpack.c.bf16 %v226_v18, %v225_v17  ;;  %v227_v23 = vld [vmem:[%s1517_s30 + $0x30] sm:$0xff]  ;;  %v1150_v25 = vld [vmem:[#allocation5 + $0x38] sm:$0xff]   ;;  %v229_v31 = vld [vmem:[%s1517_s30 + $0x40] sm:$0xff]  ;;  %p1247_p2 = pnand %p1246_p1, %p1459_p4  ;;  %s1251_s11 = scalar_lea.vmem %s1250_s10, 4096 }
  0x72   : > { %929 = vmatpush3.bf16.msra.mxu1 %v1144_v1  ;;  %961 = vmatpush3.bf16.msra.mxu0 %v1144_v1  ;;  %v247_v21 = vunpack.c.l.bf16 %v1536_v16  ;;  %v248_v22 = vunpack.c.h.bf16 %v1536_v16  ;;  %v1548_v30 = vpack.c.bf16 %v228_v24, %v227_v23  ;;  %v230_v32 = vld [vmem:[%s1517_s30 + $0x48] sm:$0xff]  ;;  %v1151_v33 = vld [vmem:[#allocation7] sm:$0xff]   ;;  %v231_v40 = vld [vmem:[%s1517_s30 + $0x50] sm:$0xff]  ;;  %p1252_p8 = scmp.lt.s32.totalorder %s1611_s17, %s1250_s10  ;;  %p1253_p13 = scmp.lt.s32.totalorder %s1251_s11, %s1245_s23 }
  0x73   : > { %930 = vmatprep.subr.bf16.mxu1 %v1145_v2  ;;  %962 = vmatprep.subr.bf16.mxu0 %v1145_v2  ;;  %v261_v10 = vsub.f32 %v221_v4, %v245_v7  ;;  %v262_v11 = vsub.f32 %v222_v5, %v246_v8  ;;  %v249_v26 = vunpack.c.l.bf16 %v1540_v20  ;;  %v250_v27 = vunpack.c.h.bf16 %v1540_v20  ;;  %v232_v41 = vld [vmem:[%s1517_s30 + $0x58] sm:$0xff]  ;;  %v1152_v42 = vld [vmem:[#allocation7 + $0x8] sm:$0xff]   ;;  %v233_v49 = vld [vmem:[%s1517_s30 + $0x60] sm:$0xff]  ;;  %p1248_p6 = pneg %p1247_p2 }
  0x74   : > { %v263_v28 = vsub.f32 %v223_v13, %v247_v21  ;;  %v264_v29 = vsub.f32 %v224_v14, %v248_v22  ;;  %v1552_v36 = vpack.c.bf16 %v230_v32, %v229_v31  ;;  %v251_v38 = vunpack.c.l.bf16 %v1548_v30  ;;  %v234_v50 = vld [vmem:[%s1517_s30 + $0x68] sm:$0xff]  ;;  %v1153_v51 = vld [vmem:[#allocation7 + $0x10] sm:$0xff]   ;;  %v236_v59 = vld [vmem:[%s1517_s30 + $0x78] sm:$0xff]  ;;  %p1254_p3 = por %p1253_p13, %p1252_p8 }
  0x75   : > { %v277_v12 = vpack.c.bf16 %v262_v11, %v261_v10  ;;  %v265_v34 = vsub.f32 %v225_v17, %v249_v26  ;;  %v266_v35 = vsub.f32 %v226_v18, %v250_v27  ;;  %v252_v39 = vunpack.c.h.bf16 %v1548_v30  ;;  %v235_v58 = vld [vmem:[%s1517_s30 + $0x70] sm:$0xff]  ;;  %v1154_v60 = vld [vmem:[#allocation7 + $0x18] sm:$0xff]   ;;  %v1156_v10 = vld [vmem:[#allocation7 + $0x28] sm:$0xff]  }
  0x76   : > { %931 = vmatpush3.bf16.msra.mxu1 %v1145_v2  ;;  %963 = vmatpush3.bf16.msra.mxu0 %v1145_v2  ;;  %v278_v37 = vpack.c.bf16 %v264_v29, %v263_v28  ;;  %v253_v44 = vunpack.c.l.bf16 %v1552_v36  ;;  %v254_v45 = vunpack.c.h.bf16 %v1552_v36  ;;  %v267_v46 = vsub.f32 %v227_v23, %v251_v38  ;;  %v1157_v14 = vld [vmem:[#allocation7 + $0x30] sm:$0xff]   ;;  %v1158_v17 = vld [vmem:[#allocation7 + $0x38] sm:$0xff]   ;;  %p1255_p7 = pnand %p1254_p3, %p1248_p6 }
  0x77   : > { %932 = vmatprep.subr.bf16.mxu1 %v1146_v3  ;;  %964 = vmatprep.subr.bf16.mxu0 %v1146_v3  ;;  %v279_v43 = vpack.c.bf16 %v266_v35, %v265_v34  ;;  %v268_v47 = vsub.f32 %v228_v24, %v252_v39  ;;  %v1561_v48 = vpack.c.bf16 %v232_v41, %v231_v40 }
  0x78   : > { %942 = vmatprep.mubr.bf16.mxu1 %v277_v12  ;;  %v269_v52 = vsub.f32 %v229_v31, %v253_v44  ;;  %v270_v53 = vsub.f32 %v230_v32, %v254_v45  ;;  %v1566_v54 = vpack.c.bf16 %v234_v50, %v233_v49  ;;  %v244_v2 = vpack.c.bf16 %v236_v59, %v235_v58 }
  0x79   : > { %v280_v55 = vpack.c.bf16 %v268_v47, %v267_v46  ;;  %v255_v56 = vunpack.c.l.bf16 %v1561_v48  ;;  %v256_v57 = vunpack.c.h.bf16 %v1561_v48 }
  0x7a   : > { %933 = vmatpush3.bf16.msra.mxu1 %v1146_v3  ;;  %965 = vmatpush3.bf16.msra.mxu0 %v1146_v3  ;;  %v281_v61 = vpack.c.bf16 %v270_v53, %v269_v52  ;;  %v257_v62 = vunpack.c.l.bf16 %v1566_v54  ;;  %v258_v63 = vunpack.c.h.bf16 %v1566_v54  ;;  %v1155_v3 = vld [vmem:[#allocation7 + $0x20] sm:$0xff]   ;;  %v259_v8 = vunpack.c.l.bf16 %v244_v2 }
  0x7b   : > { %934 = vmatprep.subr.bf16.mxu1 %v1147_v9  ;;  %966 = vmatprep.subr.bf16.mxu0 %v1147_v9  ;;  %v271_v0 = vsub.f32 %v231_v40, %v255_v56  ;;  %v272_v1 = vsub.f32 %v232_v41, %v256_v57 }
  0x7c   : > { %v273_v4 = vsub.f32 %v233_v49, %v257_v62  ;;  %v274_v5 = vsub.f32 %v234_v50, %v258_v63  ;;  %v275_v12 = vsub.f32 %v235_v58, %v259_v8 }
  0x7d   : > { %v282_v7 = vpack.c.bf16 %v272_v1, %v271_v0 }
  0x7e   : > { %935 = vmatpush3.bf16.msra.mxu1 %v1147_v9  ;;  %967 = vmatpush3.bf16.msra.mxu0 %v1147_v9  ;;  %v260_v9 = vunpack.c.h.bf16 %v244_v2  ;;  %v283_v11 = vpack.c.bf16 %v274_v5, %v273_v4 }
  0x7f   : > { %936 = vmatprep.subr.bf16.mxu1 %v1148_v15  ;;  %968 = vmatprep.subr.bf16.mxu0 %v1148_v15 }
  0x80   : > { %v276_v13 = vsub.f32 %v236_v59, %v260_v9 }
  0x82   : > { %937 = vmatpush3.bf16.msra.mxu1 %v1148_v15  ;;  %969 = vmatpush3.bf16.msra.mxu0 %v1148_v15  ;;  %v284_v15 = vpack.c.bf16 %v276_v13, %v275_v12 }
  0x83   : > { %938 = vmatprep.subr.bf16.mxu1 %v1149_v19  ;;  %970 = vmatprep.subr.bf16.mxu0 %v1149_v19 }
  0x86   : > { %939 = vmatpush3.bf16.msra.mxu1 %v1149_v19  ;;  %971 = vmatpush3.bf16.msra.mxu0 %v1149_v19 }
  0x87   : > { %940 = vmatprep.subr.bf16.mxu1 %v1150_v25  ;;  %972 = vmatprep.subr.bf16.mxu0 %v1150_v25 }
  0x8a   : > { %941 = vmatpush3.bf16.msra.mxu1 %v1150_v25  ;;  %973 = vmatpush3.bf16.msra.mxu0 %v1150_v25 }
  0x8b   : > { %990 = vmatprep.subr.bf16.mxu0 %v1151_v33  ;;  %1022 = vmatprep.subr.bf16.mxu1 %v1151_v33 }
  0x8d   : > { %943 = vmatmul.mubr.bf16.vlgmr.msra.gmra.mrb[0].mxu1 %v278_v37  ;;  %975 = vmatmul.mubr.bf16.vlgmr.msra.gmra.mrb[0].mxu0 %v1536_v16 }
  0x8e   : > { %991 = vmatpush3.bf16.msra.mxu0 %v1151_v33  ;;  %1030 = vmatpush3.bf16.msra.mxu1 %v1151_v33 }
  0x8f   : > { %992 = vmatprep.subr.bf16.mxu0 %v1152_v42  ;;  %1023 = vmatprep.subr.bf16.mxu1 %v1152_v42 }
  0x90   : > { %946 = vmatprep.mubr.bf16.mxu1 %v279_v43  ;;  %978 = vmatprep.mubr.bf16.mxu0 %v1540_v20 }
  0x92   : > { %993 = vmatpush3.bf16.msra.mxu0 %v1152_v42  ;;  %1031 = vmatpush3.bf16.msra.mxu1 %v1152_v42 }
  0x93   : > { %994 = vmatprep.subr.bf16.mxu0 %v1153_v51  ;;  %1024 = vmatprep.subr.bf16.mxu1 %v1153_v51 }
  0x95   : > { %947 = vmatmul.mubr.bf16.gmra.mrb[4].mxu1 %v280_v55  ;;  %979 = vmatmul.mubr.bf16.gmra.mrb[4].mxu0 %v1548_v30 }
  0x96   : > { %995 = vmatpush3.bf16.msra.mxu0 %v1153_v51  ;;  %1032 = vmatpush3.bf16.msra.mxu1 %v1153_v51 }
  0x97   : > { %996 = vmatprep.subr.bf16.mxu0 %v1154_v60  ;;  %1025 = vmatprep.subr.bf16.mxu1 %v1154_v60 }
  0x98   : > { %950 = vmatprep.mubr.bf16.mxu1 %v281_v61  ;;  %982 = vmatprep.mubr.bf16.mxu0 %v1552_v36 }
  0x9a   : > { %997 = vmatpush3.bf16.msra.mxu0 %v1154_v60  ;;  %1033 = vmatpush3.bf16.msra.mxu1 %v1154_v60 }
  0x9b   : > { %998 = vmatprep.subr.bf16.mxu0 %v1155_v3  ;;  %1026 = vmatprep.subr.bf16.mxu1 %v1155_v3 }
  0x9d   : > { %951 = vmatmul.mubr.bf16.gmra.mrb[8].mxu1 %v282_v7  ;;  %983 = vmatmul.mubr.bf16.gmra.mrb[8].mxu0 %v1561_v48 }
  0x9e   : > { %999 = vmatpush3.bf16.msra.mxu0 %v1155_v3  ;;  %1034 = vmatpush3.bf16.msra.mxu1 %v1155_v3 }
  0x9f   : > { %1000 = vmatprep.subr.bf16.mxu0 %v1156_v10  ;;  %1027 = vmatprep.subr.bf16.mxu1 %v1156_v10 }
  0xa0   : > { %954 = vmatprep.mubr.bf16.mxu1 %v283_v11  ;;  %986 = vmatprep.mubr.bf16.mxu0 %v1566_v54 }
  0xa2   : > { %1001 = vmatpush3.bf16.msra.mxu0 %v1156_v10  ;;  %1035 = vmatpush3.bf16.msra.mxu1 %v1156_v10 }
  0xa3   : > { %1002 = vmatprep.subr.bf16.mxu0 %v1157_v14  ;;  %1028 = vmatprep.subr.bf16.mxu1 %v1157_v14 }
  0xa5   : > { %955 = vmatmul.mubr.bf16.gmra.mrb[12].mxu1 %v284_v15  ;;  %987 = vmatmul.mubr.bf16.gmra.mrb[12].mxu0 %v244_v2 }
  0xa6   : > { %1003 = vmatpush3.bf16.msra.mxu0 %v1157_v14  ;;  %1036 = vmatpush3.bf16.msra.mxu1 %v1157_v14 }
  0xa7   : > { %1004 = vmatprep.subr.bf16.mxu0 %v1158_v17  ;;  %1029 = vmatprep.subr.bf16.mxu1 %v1158_v17 }
  0xa8   : > { %1006 = vmatprep.mubr.bf16.mxu0 %v1529_v6  ;;  %1014 = vmatprep.mubr.bf16.mxu1 %v1552_v36 }
  0xaa   : > { %1005 = vmatpush3.bf16.msra.mxu0 %v1158_v17  ;;  %1037 = vmatpush3.bf16.msra.mxu1 %v1158_v17 }
  0xad   : > { %1007 = vmatmul.mubr.bf16.vlgmr.msra.gmra.mrb[0].mxu0 %v1536_v16  ;;  %1015 = vmatmul.mubr.bf16.vlgmr.msra.gmra.mrb[16].mxu1 %v1561_v48 }
  0xae   : > { %1010 = vmatprep.mubr.bf16.mxu0 %v1540_v20  ;;  %1018 = vmatprep.mubr.bf16.mxu1 %v1566_v54 }
  0xb5   : > { %1011 = vmatmul.mubr.bf16.gmra.mrb[4].mxu0 %v1548_v30  ;;  %1019 = vmatmul.mubr.bf16.gmra.mrb[20].mxu1 %v244_v2 }
 0x160   : > { %v944_v18 = vpop.f32.mrb[0].mxu1 }
 0x161   : > { %v383_v19 = vpop.f32.mrb[1].mxu1 }
 0x162   : > { %v945_v21 = vpop.f32.mrb[2].mxu1 }
 0x163   : > { %v386_v22 = vpop.f32.mrb[3].mxu1 }
 0x168   : > { %v948_v6 = vpop.f32.mrb[4].mxu1 }
 0x169   : > { %v399_v23 = vpop.f32.mrb[5].mxu1 }
 0x16a   : > { %v1585_v24 = vpop.f32.mrb[6].mxu1 }
 0x16b   : > { %v1587_v25 = vpop.f32.mrb[7].mxu1 }
 0x170   : > { %v952_v16 = vpop.f32.mrb[8].mxu1  ;;  %v984_v26 = vpop.f32.mrb[8].mxu0 }
 0x171   : > { %v521_v27 = vadd.f32 %v984_v26, %v952_v16  ;;  %v415_v28 = vpop.f32.mrb[9].mxu1  ;;  %v512_v20 = vpop.f32.mrb[9].mxu0 }
 0x172   : > { %v513_v29 = vadd.f32 %v512_v20, %v415_v28  ;;  %v953_v31 = vpop.f32.mrb[10].mxu1  ;;  %v985_v32 = vpop.f32.mrb[10].mxu0 }
 0x173   : > { %v524_v30 = vadd.f32 %v985_v32, %v953_v31  ;;  %v418_v33 = vpop.f32.mrb[11].mxu1  ;;  %v515_v34 = vpop.f32.mrb[11].mxu0 }
 0x174   : > { %v516_v35 = vadd.f32 %v515_v34, %v418_v33 }
 0x178   : > { %v956_v36 = vpop.f32.mrb[12].mxu1  ;;  %v988_v37 = vpop.f32.mrb[12].mxu0 }
 0x179   : > { %v537_v38 = vadd.f32 %v988_v37, %v956_v36  ;;  %v431_v39 = vpop.f32.mrb[13].mxu1  ;;  %v528_v40 = vpop.f32.mrb[13].mxu0 }
 0x17a   : > { %v529_v41 = vadd.f32 %v528_v40, %v431_v39  ;;  %v957_v42 = vpop.f32.mrb[14].mxu1  ;;  %v989_v43 = vpop.f32.mrb[14].mxu0 }
 0x17b   : > { %v540_v44 = vadd.f32 %v989_v43, %v957_v42  ;;  %v434_v45 = vpop.f32.mrb[15].mxu1  ;;  %v531_v46 = vpop.f32.mrb[15].mxu0 }
 0x17c   : > { %v532_v47 = vadd.f32 %v531_v46, %v434_v45 }
 0x180   : > { %v1008_v48 = vpop.f32.mrb[0].mxu0  ;;  %v1016_v49 = vpop.f32.mrb[16].mxu1 }
 0x181   : > { %v1038_v50 = vadd.f32 %v1008_v48, %v944_v18  ;;  %v714_v51 = vadd.f32 %v1016_v49, %v521_v27  ;;  %v641_v52 = vpop.f32.mrb[1].mxu0  ;;  %v673_v53 = vpop.f32.mrb[17].mxu1 }
 0x182   : > { %v1039_v54 = vadd.f32 %v641_v52, %v383_v19  ;;  %v712_v55 = vadd.f32 %v673_v53, %v513_v29  ;;  %v1009_v56 = vpop.f32.mrb[2].mxu0  ;;  %v1017_v57 = vpop.f32.mrb[18].mxu1 }
 0x183   : > { %722 = vst [vmem:[%s1591_s18 + $0x10] sm:$0xff] %v1038_v50  ;;  %730 = vst [vmem:[%s1591_s18 + $0x50] sm:$0xff] %v714_v51  ;;  %v1040_v58 = vadd.f32 %v1009_v56, %v945_v21  ;;  %v715_v59 = vadd.f32 %v1017_v57, %v524_v30  ;;  %v644_v60 = vpop.f32.mrb[3].mxu0  ;;  %v676_v61 = vpop.f32.mrb[19].mxu1 }
 0x184   : > { %720 = vst [vmem:[%s1591_s18] sm:$0xff] %v1039_v54  ;;  %728 = vst [vmem:[%s1591_s18 + $0x40] sm:$0xff] %v712_v55  ;;  %v1041_v62 = vadd.f32 %v644_v60, %v386_v22  ;;  %v713_v63 = vadd.f32 %v676_v61, %v516_v35 }
 0x185   : > { %723 = vst [vmem:[%s1591_s18 + $0x18] sm:$0xff] %v1040_v58  ;;  %731 = vst [vmem:[%s1591_s18 + $0x58] sm:$0xff] %v715_v59 }
 0x186   : > { %721 = vst [vmem:[%s1591_s18 + $0x8] sm:$0xff] %v1041_v62  ;;  %729 = vst [vmem:[%s1591_s18 + $0x48] sm:$0xff] %v713_v63 }
 0x188   : > { %v1012_v0 = vpop.f32.mrb[4].mxu0  ;;  %v1020_v1 = vpop.f32.mrb[20].mxu1 }
 0x189   : > { %v1042_v2 = vadd.f32 %v1012_v0, %v948_v6  ;;  %v718_v3 = vadd.f32 %v1020_v1, %v537_v38  ;;  %v657_v4 = vpop.f32.mrb[5].mxu0  ;;  %v689_v5 = vpop.f32.mrb[21].mxu1 }
 0x18a   : > { %v1043_v7 = vadd.f32 %v657_v4, %v399_v23  ;;  %v716_v8 = vadd.f32 %v689_v5, %v529_v41  ;;  %v1013_v9 = vpop.f32.mrb[6].mxu0  ;;  %v1021_v10 = vpop.f32.mrb[22].mxu1 }
 0x18b   : > { %726 = vst [vmem:[%s1591_s18 + $0x30] sm:$0xff] %v1042_v2  ;;  %734 = vst [vmem:[%s1591_s18 + $0x70] sm:$0xff] %v718_v3  ;;  %v1044_v11 = vadd.f32 %v1013_v9, %v1585_v24  ;;  %v719_v12 = vadd.f32 %v1021_v10, %v540_v44  ;;  %v660_v13 = vpop.f32.mrb[7].mxu0  ;;  %v692_v14 = vpop.f32.mrb[23].mxu1 }
 0x18c   : > { %724 = vst [vmem:[%s1591_s18 + $0x20] sm:$0xff] %v1043_v7  ;;  %732 = vst [vmem:[%s1591_s18 + $0x60] sm:$0xff] %v716_v8  ;;  %v1045_v15 = vadd.f32 %v660_v13, %v1587_v25  ;;  %v717_v17 = vadd.f32 %v692_v14, %v532_v47 }
 0x18d   : > { %727 = vst [vmem:[%s1591_s18 + $0x38] sm:$0xff] %v1044_v11  ;;  %735 = vst [vmem:[%s1591_s18 + $0x78] sm:$0xff] %v719_v12 }
 0x18e   : > { %725 = vst [vmem:[%s1591_s18 + $0x28] sm:$0xff] %v1045_v15  ;;  %733 = vst [vmem:[%s1591_s18 + $0x68] sm:$0xff] %v717_v17 }
 0x18f   : > { %1258 = shalt.err (!%p1255_p7)
}
 0x190   : > { %s1259_s25 = scalar_lea.hbm %s1609_s26, 2048  ;;  %s1263_s21 = scalar_lea.hbm %s1664_s3, 8192 }
 0x191   : > { %p1260_p9 = scmp.ne.s32.totalorder %s1609_s26, %s1259_s25  ;;  %p1264_p5 = scmp.lt.u32.totalorder %s1609_s26, %s1664_s3 }
 0x192   : > { %p1265_p10 = scmp.lt.u32.totalorder %s1263_s21, %s1259_s25  ;;  %p1267_p1 = scmp.lt.u32.totalorder %s1259_s25, %s1609_s26 }
 0x193   : > { %p1261_p12 = pnand %p1260_p9, %p1459_p4 }
 0x194   : > { %p1266_p11 = por %p1265_p10, %p1264_p5 }
 0x195   : > { %p1262_p0 = pneg %p1261_p12 }
 0x196   : > { %p1268_p2 = por %p1267_p1, %p1266_p11 }
 0x198   : > { %p1269_p6 = pnand %p1268_p2, %p1262_p0 }
 0x19a   : > { %1272 = shalt.err (!%p1269_p6)
}
 0x19b   : > { %s1325_s30 = smov 128   ;;  %s1326_s18 = smov 8  }
 0x19c   : > { %1080 = dma.vmem_to_hbm [thread:$0]  (%p1459_p4), %s1611_s17, 2048, %s1609_s26, %s737_s27, %s1325_s30, %s1325_s30, %s1326_s18  }
 0x19d PF: > { %p1102_p8 = scmp.ge.s32.totalorder %s1315_s15, 2  ;;  %s765_s20 = sand.u32 1, %s1303_s12  }
 0x19e   : > { %p1679_p13 = scmp.ne.s32.totalorder %s1669_s19, 0  ;;  %s766_s16 = scalar_lea.sflag [#allocation4], %s765_s20 }
 0x1a0   : > { %p1094_p3 = pnand %p1102_p8, %p1679_p13 }
 0x1a2   : > { %1298 = dma.done.wait (!%p1094_p3), %s766_s16, 2048  }
 0x1a3   : > { %1300 = vsyncadd (!%p1094_p3), %s766_s16, 4294965248  ;;  %p17_p7 = scmp.ge.s32.totalorder %s1449_s4, 6   ;;  %s1680_s12 = smov %s1307_s13 }
 0x1a4   : > { %s1681_s13 = smov %s1311_s14  ;;  %s1682_s14 = smov %s1465_s9 }
 0x1a5   : > { %s1683_s15 = smov %s1449_s4  ;;  %19 = sbr.rel (!%p17_p7) target bundleno = 6 (0x6), region = 85 }
 0x1ac   :  { %771 = vsyncpa [#allocation3], 1 }
 0x1ad   :  { %773 = vsyncpa [#allocation3 + $0x1], 1 }
 0x1ae   :  { %774 = vsyncpa [#allocation6], 1 }
 0x1af   :  { %775 = vsyncpa [#allocation4], 1 }
 0x1b0   :  { %777 = vsyncpa [#allocation4 + $0x1], 1 }

</bundles_post_ra>
